<compile_context>
chip_gen: v5e
topology: v5e:2x2
jax: 0.10.0
libtpu: 0.0.40
codegen_flags: <defaults>
</compile_context>

<pallas_src>
import jax
import jax.numpy as jnp
from jax.experimental import pallas as pl
from jax.experimental.pallas import tpu as pltpu


def _cdiv(a, b):
    return -(-a // b)


def _round_up(x, m):
    return _cdiv(x, m) * m


def _conv1x1_relu_kernel(w_ref, b_ref, x_ref, o_ref):
    """1x1 conv + bias + ReLU on dense (TR, 128) channel planes, VPU-only.

    w_ref: SMEM (Cout*Cin,)   f32 weights, row-major (co, ci)
    b_ref: SMEM (Cout,)       f32 bias
    x_ref: VMEM (Cin, TR, 128)  f32 input tile (spatial fills sublanes+lanes)
    o_ref: VMEM (Cout, TR, 128) f32 output tile
    """
    cin = x_ref.shape[0]
    cout = o_ref.shape[0]

    # Cout x Cin scalar-broadcast FMAs on full (TR, 128) planes.  Input planes
    # are re-sliced from VMEM per output channel (cheap vld; avoids holding
    # Cin large planes live across the whole unrolled loop).
    for co in range(cout):
        acc = x_ref[0] * w_ref[co * cin + 0]
        for ci in range(1, cin):
            acc = acc + x_ref[ci] * w_ref[co * cin + ci]
        o_ref[co] = jnp.maximum(acc + b_ref[co], 0.0).astype(o_ref.dtype)


def conv1x1_relu_pallas(x_nchw, w, b, *,
                        target_tile_bytes=6 << 20,
                        vmem_budget_bytes=24 << 20):
    """relu(conv1x1(x) + b) for NCHW input.

    x_nchw: (N, Cin, H, W) f32
    w:      (Cout, Cin)    f32
    b:      (Cout,)        f32
    returns (N, Cout, H, W) f32
    """
    N, Cin, H, W = x_nchw.shape
    Cout, Cin_w = w.shape
    assert Cin_w == Cin, (Cin_w, Cin)
    M = H * W

    # Spatial axis -> (R, 128) planes: lanes fully dense, sublanes carry rows.
    R = _cdiv(M, 128)
    m_pad = R * 128

    x3 = x_nchw.reshape(N, Cin, M)          # pure reshape, no transpose
    padded = (m_pad != M)
    if padded:
        # Only tiny inputs (H*W not a multiple of 128) take this extra pass.
        x3 = jnp.pad(x3, ((0, 0), (0, 0), (0, m_pad - M)))
    x4 = x3.reshape(N, Cin, R, 128)

    # --- Tile-size selection -------------------------------------------------
    # bytes of (input + output) data per row of 128 spatial positions.
    bytes_per_row = (Cin + Cout) * 128 * 4
    max_tr_target = max(8, target_tile_bytes // bytes_per_row)
    max_tr_budget = max(8, vmem_budget_bytes // (2 * bytes_per_row))  # dbl-buf
    tr = max(8, (min(max_tr_target, max_tr_budget) // 8) * 8)
    tr = min(tr, R)                      # full-extent block allowed if tr == R

    # Keep >= 4 grid steps along the parallel axes so both v7x TensorCores get
    # work even when N is small (tile shrink only while tr stays a multiple of 8).
    grid_r = _cdiv(R, tr)
    while N * grid_r < 4 and tr > 8:
        tr = max(8, ((tr // 2) // 8) * 8)
        grid_r = _cdiv(R, tr)

    grid = (N, grid_r)
    w_flat = w.reshape(-1)               # 1D SMEM: avoids 2D SMEM word padding

    out4 = pl.pallas_call(
        _conv1x1_relu_kernel,
        out_shape=jax.ShapeDtypeStruct((N, Cout, R, 128), jnp.float32),
        grid=grid,
        in_specs=[
            pl.BlockSpec(memory_space=pltpu.MemorySpace.SMEM),  # w  (Cout*Cin,)
            pl.BlockSpec(memory_space=pltpu.MemorySpace.SMEM),  # b  (Cout,)
            pl.BlockSpec((pl.Squeezed(), Cin, tr, 128),
                         lambda n, i: (n, 0, i, 0)),            # x tile
        ],
        out_specs=pl.BlockSpec((pl.Squeezed(), Cout, tr, 128),
                               lambda n, i: (n, 0, i, 0)),
        compiler_params=pltpu.CompilerParams(
            dimension_semantics=("parallel", "parallel")),
    )(w_flat, b, x4)

    out3 = out4.reshape(N, Cout, m_pad)
    if padded:
        out3 = out3[:, :, :M]
    return out3.reshape(N, Cout, H, W)


def reference(x_nchw, w, b):
    # Pure-JAX reference: 1x1 conv == channel matmul, then bias + ReLU.
    y = jnp.einsum("nchw,oc->nohw", x_nchw, w) + b[None, :, None, None]
    return jnp.maximum(y, 0.0)


if __name__ == "__main__":
    key = jax.random.PRNGKey(0)
    kx, kw, kb = jax.random.split(key, 3)

    # Small but realistic shapes consistent with the module (NCHW feature map).
    N, Cin, H, W = 2, 4, 16, 16
    Cout = 8
    x = jax.random.normal(kx, (N, Cin, H, W), dtype=jnp.float32)
    w = jax.random.normal(kw, (Cout, Cin), dtype=jnp.float32) / jnp.sqrt(
        jnp.float32(Cin))
    b = jax.random.normal(kb, (Cout,), dtype=jnp.float32) * 0.1

    out = jax.block_until_ready(conv1x1_relu_pallas(x, w, b))
    ref = reference(x, w, b)
    assert out.shape == (N, Cout, H, W), out.shape
    assert jnp.allclose(out, ref, atol=1e-4, rtol=1e-5), "mismatch vs reference"

    # Original WhiteFox example input (1, 3, 2, 3): exercises the tiny /
    # lane-padding fallback path (M = 6 < 128).
    x1 = jnp.array(
        [[[[0.0, 1.0, 2.0], [-29.0, -2.0, -1.0]],
          [[3.0, 4.0, 5.0], [6.0, 7.0, 8.0]],
          [[9.0, 10.0, 11.0], [12.0, 13.0, 14.0]]]],
        dtype=jnp.float32,
    )
    w1 = jax.random.normal(kw, (Cout, 3), dtype=jnp.float32) / jnp.sqrt(
        jnp.float32(3))
    out1 = jax.block_until_ready(conv1x1_relu_pallas(x1, w1, b))
    ref1 = reference(x1, w1, b)
    assert out1.shape == (1, Cout, 2, 3), out1.shape
    assert jnp.allclose(out1, ref1, atol=1e-4, rtol=1e-5), "mismatch (tiny input)"

    print("KERNEL_OK")
</pallas_src>

<mosaic_0001>
module attributes {stable_mosaic.version = 11 : i64} {
  func.func @_conv1x1_relu_kernel(%arg0: i32, %arg1: i32, %arg2: memref<32xf32, #tpu.memory_space<smem>>, %arg3: memref<8xf32, #tpu.memory_space<smem>>, %arg4: memref<1x4x2x128xf32, #tpu.memory_space<vmem>>, %arg5: memref<1x8x2x128xf32, #tpu.memory_space<vmem>>) attributes {dimension_semantics = [#tpu.dimension_semantics<parallel>, #tpu.dimension_semantics<parallel>], iteration_bounds = array<i64: 2, 1>, scalar_prefetch = 0 : i64, scratch_operands = 0 : i64, tpu.core_type = #tpu.core_type<tc>, window_params = [{transform_indices = @transform_0, window_bounds = array<i64: 32>}, {transform_indices = @transform_1, window_bounds = array<i64: 8>}, {transform_indices = @transform_2, window_bounds = array<i64: 1, 4, 2, 128>}, {transform_indices = @transform_3, window_bounds = array<i64: 1, 8, 2, 128>}]} {
    %c0 = arith.constant 0 : index
    %c0_0 = arith.constant 0 : index
    %c0_1 = arith.constant 0 : index
    %c0_2 = arith.constant 0 : index
    %0 = vector.load %arg4[%c0, %c0_0, %c0_1, %c0_2] : memref<1x4x2x128xf32, #tpu.memory_space<vmem>>, vector<1x1x2x128xf32>
    %1 = vector.shape_cast %0 : vector<1x1x2x128xf32> to vector<2x128xf32>
    %c0_3 = arith.constant 0 : index
    %2 = memref.load %arg2[%c0_3] : memref<32xf32, #tpu.memory_space<smem>>
    %3 = vector.broadcast %2 : f32 to vector<2x128xf32>
    %4 = arith.mulf %1, %3 : vector<2x128xf32>
    %c0_4 = arith.constant 0 : index
    %c1 = arith.constant 1 : index
    %c0_5 = arith.constant 0 : index
    %c0_6 = arith.constant 0 : index
    %5 = vector.load %arg4[%c0_4, %c1, %c0_5, %c0_6] : memref<1x4x2x128xf32, #tpu.memory_space<vmem>>, vector<1x1x2x128xf32>
    %6 = vector.shape_cast %5 : vector<1x1x2x128xf32> to vector<2x128xf32>
    %c1_7 = arith.constant 1 : index
    %7 = memref.load %arg2[%c1_7] : memref<32xf32, #tpu.memory_space<smem>>
    %8 = vector.broadcast %7 : f32 to vector<2x128xf32>
    %9 = arith.mulf %6, %8 : vector<2x128xf32>
    %10 = arith.addf %4, %9 : vector<2x128xf32>
    %c0_8 = arith.constant 0 : index
    %c2 = arith.constant 2 : index
    %c0_9 = arith.constant 0 : index
    %c0_10 = arith.constant 0 : index
    %11 = vector.load %arg4[%c0_8, %c2, %c0_9, %c0_10] : memref<1x4x2x128xf32, #tpu.memory_space<vmem>>, vector<1x1x2x128xf32>
    %12 = vector.shape_cast %11 : vector<1x1x2x128xf32> to vector<2x128xf32>
    %c2_11 = arith.constant 2 : index
    %13 = memref.load %arg2[%c2_11] : memref<32xf32, #tpu.memory_space<smem>>
    %14 = vector.broadcast %13 : f32 to vector<2x128xf32>
    %15 = arith.mulf %12, %14 : vector<2x128xf32>
    %16 = arith.addf %10, %15 : vector<2x128xf32>
    %c0_12 = arith.constant 0 : index
    %c3 = arith.constant 3 : index
    %c0_13 = arith.constant 0 : index
    %c0_14 = arith.constant 0 : index
    %17 = vector.load %arg4[%c0_12, %c3, %c0_13, %c0_14] : memref<1x4x2x128xf32, #tpu.memory_space<vmem>>, vector<1x1x2x128xf32>
    %18 = vector.shape_cast %17 : vector<1x1x2x128xf32> to vector<2x128xf32>
    %c3_15 = arith.constant 3 : index
    %19 = memref.load %arg2[%c3_15] : memref<32xf32, #tpu.memory_space<smem>>
    %20 = vector.broadcast %19 : f32 to vector<2x128xf32>
    %21 = arith.mulf %18, %20 : vector<2x128xf32>
    %22 = arith.addf %16, %21 : vector<2x128xf32>
    %c0_16 = arith.constant 0 : index
    %23 = memref.load %arg3[%c0_16] : memref<8xf32, #tpu.memory_space<smem>>
    %24 = vector.broadcast %23 : f32 to vector<2x128xf32>
    %25 = arith.addf %22, %24 : vector<2x128xf32>
    %cst = arith.constant 0.000000e+00 : f32
    %26 = vector.broadcast %cst : f32 to vector<2x128xf32>
    %27 = arith.maximumf %25, %26 : vector<2x128xf32>
    %c0_17 = arith.constant 0 : index
    %c0_18 = arith.constant 0 : index
    %c0_19 = arith.constant 0 : index
    %c0_20 = arith.constant 0 : index
    %28 = vector.load %arg5[%c0_17, %c0_18, %c0_19, %c0_20] : memref<1x8x2x128xf32, #tpu.memory_space<vmem>>, vector<1x1x2x128xf32>
    %29 = vector.shape_cast %28 : vector<1x1x2x128xf32> to vector<2x128xf32>
    %30 = vector.shape_cast %27 : vector<2x128xf32> to vector<1x1x2x128xf32>
    tpu.vector_store %arg5[%c0_17, %c0_18, %c0_19, %c0_20], %30 {strides = array<i32>} : memref<1x8x2x128xf32, #tpu.memory_space<vmem>>, vector<1x1x2x128xf32>,
    %c0_21 = arith.constant 0 : index
    %c0_22 = arith.constant 0 : index
    %c0_23 = arith.constant 0 : index
    %c0_24 = arith.constant 0 : index
    %31 = vector.load %arg4[%c0_21, %c0_22, %c0_23, %c0_24] : memref<1x4x2x128xf32, #tpu.memory_space<vmem>>, vector<1x1x2x128xf32>
    %32 = vector.shape_cast %31 : vector<1x1x2x128xf32> to vector<2x128xf32>
    %c4 = arith.constant 4 : index
    %33 = memref.load %arg2[%c4] : memref<32xf32, #tpu.memory_space<smem>>
    %34 = vector.broadcast %33 : f32 to vector<2x128xf32>
    %35 = arith.mulf %32, %34 : vector<2x128xf32>
    %c0_25 = arith.constant 0 : index
    %c1_26 = arith.constant 1 : index
    %c0_27 = arith.constant 0 : index
    %c0_28 = arith.constant 0 : index
    %36 = vector.load %arg4[%c0_25, %c1_26, %c0_27, %c0_28] : memref<1x4x2x128xf32, #tpu.memory_space<vmem>>, vector<1x1x2x128xf32>
    %37 = vector.shape_cast %36 : vector<1x1x2x128xf32> to vector<2x128xf32>
    %c5 = arith.constant 5 : index
    %38 = memref.load %arg2[%c5] : memref<32xf32, #tpu.memory_space<smem>>
    %39 = vector.broadcast %38 : f32 to vector<2x128xf32>
    %40 = arith.mulf %37, %39 : vector<2x128xf32>
    %41 = arith.addf %35, %40 : vector<2x128xf32>
    %c0_29 = arith.constant 0 : index
    %c2_30 = arith.constant 2 : index
    %c0_31 = arith.constant 0 : index
    %c0_32 = arith.constant 0 : index
    %42 = vector.load %arg4[%c0_29, %c2_30, %c0_31, %c0_32] : memref<1x4x2x128xf32, #tpu.memory_space<vmem>>, vector<1x1x2x128xf32>
    %43 = vector.shape_cast %42 : vector<1x1x2x128xf32> to vector<2x128xf32>
    %c6 = arith.constant 6 : index
    %44 = memref.load %arg2[%c6] : memref<32xf32, #tpu.memory_space<smem>>
    %45 = vector.broadcast %44 : f32 to vector<2x128xf32>
    %46 = arith.mulf %43, %45 : vector<2x128xf32>
    %47 = arith.addf %41, %46 : vector<2x128xf32>
    %c0_33 = arith.constant 0 : index
    %c3_34 = arith.constant 3 : index
    %c0_35 = arith.constant 0 : index
    %c0_36 = arith.constant 0 : index
    %48 = vector.load %arg4[%c0_33, %c3_34, %c0_35, %c0_36] : memref<1x4x2x128xf32, #tpu.memory_space<vmem>>, vector<1x1x2x128xf32>
    %49 = vector.shape_cast %48 : vector<1x1x2x128xf32> to vector<2x128xf32>
    %c7 = arith.constant 7 : index
    %50 = memref.load %arg2[%c7] : memref<32xf32, #tpu.memory_space<smem>>
    %51 = vector.broadcast %50 : f32 to vector<2x128xf32>
    %52 = arith.mulf %49, %51 : vector<2x128xf32>
    %53 = arith.addf %47, %52 : vector<2x128xf32>
    %c1_37 = arith.constant 1 : index
    %54 = memref.load %arg3[%c1_37] : memref<8xf32, #tpu.memory_space<smem>>
    %55 = vector.broadcast %54 : f32 to vector<2x128xf32>
    %56 = arith.addf %53, %55 : vector<2x128xf32>
    %cst_38 = arith.constant 0.000000e+00 : f32
    %57 = vector.broadcast %cst_38 : f32 to vector<2x128xf32>
    %58 = arith.maximumf %56, %57 : vector<2x128xf32>
    %c0_39 = arith.constant 0 : index
    %c1_40 = arith.constant 1 : index
    %c0_41 = arith.constant 0 : index
    %c0_42 = arith.constant 0 : index
    %59 = vector.load %arg5[%c0_39, %c1_40, %c0_41, %c0_42] : memref<1x8x2x128xf32, #tpu.memory_space<vmem>>, vector<1x1x2x128xf32>
    %60 = vector.shape_cast %59 : vector<1x1x2x128xf32> to vector<2x128xf32>
    %61 = vector.shape_cast %58 : vector<2x128xf32> to vector<1x1x2x128xf32>
    tpu.vector_store %arg5[%c0_39, %c1_40, %c0_41, %c0_42], %61 {strides = array<i32>} : memref<1x8x2x128xf32, #tpu.memory_space<vmem>>, vector<1x1x2x128xf32>,
    %c0_43 = arith.constant 0 : index
    %c0_44 = arith.constant 0 : index
    %c0_45 = arith.constant 0 : index
    %c0_46 = arith.constant 0 : index
    %62 = vector.load %arg4[%c0_43, %c0_44, %c0_45, %c0_46] : memref<1x4x2x128xf32, #tpu.memory_space<vmem>>, vector<1x1x2x128xf32>
    %63 = vector.shape_cast %62 : vector<1x1x2x128xf32> to vector<2x128xf32>
    %c8 = arith.constant 8 : index
    %64 = memref.load %arg2[%c8] : memref<32xf32, #tpu.memory_space<smem>>
    %65 = vector.broadcast %64 : f32 to vector<2x128xf32>
    %66 = arith.mulf %63, %65 : vector<2x128xf32>
    %c0_47 = arith.constant 0 : index
    %c1_48 = arith.constant 1 : index
    %c0_49 = arith.constant 0 : index
    %c0_50 = arith.constant 0 : index
    %67 = vector.load %arg4[%c0_47, %c1_48, %c0_49, %c0_50] : memref<1x4x2x128xf32, #tpu.memory_space<vmem>>, vector<1x1x2x128xf32>
    %68 = vector.shape_cast %67 : vector<1x1x2x128xf32> to vector<2x128xf32>
    %c9 = arith.constant 9 : index
    %69 = memref.load %arg2[%c9] : memref<32xf32, #tpu.memory_space<smem>>
    %70 = vector.broadcast %69 : f32 to vector<2x128xf32>
    %71 = arith.mulf %68, %70 : vector<2x128xf32>
    %72 = arith.addf %66, %71 : vector<2x128xf32>
    %c0_51 = arith.constant 0 : index
    %c2_52 = arith.constant 2 : index
    %c0_53 = arith.constant 0 : index
    %c0_54 = arith.constant 0 : index
    %73 = vector.load %arg4[%c0_51, %c2_52, %c0_53, %c0_54] : memref<1x4x2x128xf32, #tpu.memory_space<vmem>>, vector<1x1x2x128xf32>
    %74 = vector.shape_cast %73 : vector<1x1x2x128xf32> to vector<2x128xf32>
    %c10 = arith.constant 10 : index
    %75 = memref.load %arg2[%c10] : memref<32xf32, #tpu.memory_space<smem>>
    %76 = vector.broadcast %75 : f32 to vector<2x128xf32>
    %77 = arith.mulf %74, %76 : vector<2x128xf32>
    %78 = arith.addf %72, %77 : vector<2x128xf32>
    %c0_55 = arith.constant 0 : index
    %c3_56 = arith.constant 3 : index
    %c0_57 = arith.constant 0 : index
    %c0_58 = arith.constant 0 : index
    %79 = vector.load %arg4[%c0_55, %c3_56, %c0_57, %c0_58] : memref<1x4x2x128xf32, #tpu.memory_space<vmem>>, vector<1x1x2x128xf32>
    %80 = vector.shape_cast %79 : vector<1x1x2x128xf32> to vector<2x128xf32>
    %c11 = arith.constant 11 : index
    %81 = memref.load %arg2[%c11] : memref<32xf32, #tpu.memory_space<smem>>
    %82 = vector.broadcast %81 : f32 to vector<2x128xf32>
    %83 = arith.mulf %80, %82 : vector<2x128xf32>
    %84 = arith.addf %78, %83 : vector<2x128xf32>
    %c2_59 = arith.constant 2 : index
    %85 = memref.load %arg3[%c2_59] : memref<8xf32, #tpu.memory_space<smem>>
    %86 = vector.broadcast %85 : f32 to vector<2x128xf32>
    %87 = arith.addf %84, %86 : vector<2x128xf32>
    %cst_60 = arith.constant 0.000000e+00 : f32
    %88 = vector.broadcast %cst_60 : f32 to vector<2x128xf32>
    %89 = arith.maximumf %87, %88 : vector<2x128xf32>
    %c0_61 = arith.constant 0 : index
    %c2_62 = arith.constant 2 : index
    %c0_63 = arith.constant 0 : index
    %c0_64 = arith.constant 0 : index
    %90 = vector.load %arg5[%c0_61, %c2_62, %c0_63, %c0_64] : memref<1x8x2x128xf32, #tpu.memory_space<vmem>>, vector<1x1x2x128xf32>
    %91 = vector.shape_cast %90 : vector<1x1x2x128xf32> to vector<2x128xf32>
    %92 = vector.shape_cast %89 : vector<2x128xf32> to vector<1x1x2x128xf32>
    tpu.vector_store %arg5[%c0_61, %c2_62, %c0_63, %c0_64], %92 {strides = array<i32>} : memref<1x8x2x128xf32, #tpu.memory_space<vmem>>, vector<1x1x2x128xf32>,
    %c0_65 = arith.constant 0 : index
    %c0_66 = arith.constant 0 : index
    %c0_67 = arith.constant 0 : index
    %c0_68 = arith.constant 0 : index
    %93 = vector.load %arg4[%c0_65, %c0_66, %c0_67, %c0_68] : memref<1x4x2x128xf32, #tpu.memory_space<vmem>>, vector<1x1x2x128xf32>
    %94 = vector.shape_cast %93 : vector<1x1x2x128xf32> to vector<2x128xf32>
    %c12 = arith.constant 12 : index
    %95 = memref.load %arg2[%c12] : memref<32xf32, #tpu.memory_space<smem>>
    %96 = vector.broadcast %95 : f32 to vector<2x128xf32>
    %97 = arith.mulf %94, %96 : vector<2x128xf32>
    %c0_69 = arith.constant 0 : index
    %c1_70 = arith.constant 1 : index
    %c0_71 = arith.constant 0 : index
    %c0_72 = arith.constant 0 : index
    %98 = vector.load %arg4[%c0_69, %c1_70, %c0_71, %c0_72] : memref<1x4x2x128xf32, #tpu.memory_space<vmem>>, vector<1x1x2x128xf32>
    %99 = vector.shape_cast %98 : vector<1x1x2x128xf32> to vector<2x128xf32>
    %c13 = arith.constant 13 : index
    %100 = memref.load %arg2[%c13] : memref<32xf32, #tpu.memory_space<smem>>
    %101 = vector.broadcast %100 : f32 to vector<2x128xf32>
    %102 = arith.mulf %99, %101 : vector<2x128xf32>
    %103 = arith.addf %97, %102 : vector<2x128xf32>
    %c0_73 = arith.constant 0 : index
    %c2_74 = arith.constant 2 : index
    %c0_75 = arith.constant 0 : index
    %c0_76 = arith.constant 0 : index
    %104 = vector.load %arg4[%c0_73, %c2_74, %c0_75, %c0_76] : memref<1x4x2x128xf32, #tpu.memory_space<vmem>>, vector<1x1x2x128xf32>
    %105 = vector.shape_cast %104 : vector<1x1x2x128xf32> to vector<2x128xf32>
    %c14 = arith.constant 14 : index
    %106 = memref.load %arg2[%c14] : memref<32xf32, #tpu.memory_space<smem>>
    %107 = vector.broadcast %106 : f32 to vector<2x128xf32>
    %108 = arith.mulf %105, %107 : vector<2x128xf32>
    %109 = arith.addf %103, %108 : vector<2x128xf32>
    %c0_77 = arith.constant 0 : index
    %c3_78 = arith.constant 3 : index
    %c0_79 = arith.constant 0 : index
    %c0_80 = arith.constant 0 : index
    %110 = vector.load %arg4[%c0_77, %c3_78, %c0_79, %c0_80] : memref<1x4x2x128xf32, #tpu.memory_space<vmem>>, vector<1x1x2x128xf32>
    %111 = vector.shape_cast %110 : vector<1x1x2x128xf32> to vector<2x128xf32>
    %c15 = arith.constant 15 : index
    %112 = memref.load %arg2[%c15] : memref<32xf32, #tpu.memory_space<smem>>
    %113 = vector.broadcast %112 : f32 to vector<2x128xf32>
    %114 = arith.mulf %111, %113 : vector<2x128xf32>
    %115 = arith.addf %109, %114 : vector<2x128xf32>
    %c3_81 = arith.constant 3 : index
    %116 = memref.load %arg3[%c3_81] : memref<8xf32, #tpu.memory_space<smem>>
    %117 = vector.broadcast %116 : f32 to vector<2x128xf32>
    %118 = arith.addf %115, %117 : vector<2x128xf32>
    %cst_82 = arith.constant 0.000000e+00 : f32
    %119 = vector.broadcast %cst_82 : f32 to vector<2x128xf32>
    %120 = arith.maximumf %118, %119 : vector<2x128xf32>
    %c0_83 = arith.constant 0 : index
    %c3_84 = arith.constant 3 : index
    %c0_85 = arith.constant 0 : index
    %c0_86 = arith.constant 0 : index
    %121 = vector.load %arg5[%c0_83, %c3_84, %c0_85, %c0_86] : memref<1x8x2x128xf32, #tpu.memory_space<vmem>>, vector<1x1x2x128xf32>
    %122 = vector.shape_cast %121 : vector<1x1x2x128xf32> to vector<2x128xf32>
    %123 = vector.shape_cast %120 : vector<2x128xf32> to vector<1x1x2x128xf32>
    tpu.vector_store %arg5[%c0_83, %c3_84, %c0_85, %c0_86], %123 {strides = array<i32>} : memref<1x8x2x128xf32, #tpu.memory_space<vmem>>, vector<1x1x2x128xf32>,
    %c0_87 = arith.constant 0 : index
    %c0_88 = arith.constant 0 : index
    %c0_89 = arith.constant 0 : index
    %c0_90 = arith.constant 0 : index
    %124 = vector.load %arg4[%c0_87, %c0_88, %c0_89, %c0_90] : memref<1x4x2x128xf32, #tpu.memory_space<vmem>>, vector<1x1x2x128xf32>
    %125 = vector.shape_cast %124 : vector<1x1x2x128xf32> to vector<2x128xf32>
    %c16 = arith.constant 16 : index
    %126 = memref.load %arg2[%c16] : memref<32xf32, #tpu.memory_space<smem>>
    %127 = vector.broadcast %126 : f32 to vector<2x128xf32>
    %128 = arith.mulf %125, %127 : vector<2x128xf32>
    %c0_91 = arith.constant 0 : index
    %c1_92 = arith.constant 1 : index
    %c0_93 = arith.constant 0 : index
    %c0_94 = arith.constant 0 : index
    %129 = vector.load %arg4[%c0_91, %c1_92, %c0_93, %c0_94] : memref<1x4x2x128xf32, #tpu.memory_space<vmem>>, vector<1x1x2x128xf32>
    %130 = vector.shape_cast %129 : vector<1x1x2x128xf32> to vector<2x128xf32>
    %c17 = arith.constant 17 : index
    %131 = memref.load %arg2[%c17] : memref<32xf32, #tpu.memory_space<smem>>
    %132 = vector.broadcast %131 : f32 to vector<2x128xf32>
    %133 = arith.mulf %130, %132 : vector<2x128xf32>
    %134 = arith.addf %128, %133 : vector<2x128xf32>
    %c0_95 = arith.constant 0 : index
    %c2_96 = arith.constant 2 : index
    %c0_97 = arith.constant 0 : index
    %c0_98 = arith.constant 0 : index
    %135 = vector.load %arg4[%c0_95, %c2_96, %c0_97, %c0_98] : memref<1x4x2x128xf32, #tpu.memory_space<vmem>>, vector<1x1x2x128xf32>
    %136 = vector.shape_cast %135 : vector<1x1x2x128xf32> to vector<2x128xf32>
    %c18 = arith.constant 18 : index
    %137 = memref.load %arg2[%c18] : memref<32xf32, #tpu.memory_space<smem>>
    %138 = vector.broadcast %137 : f32 to vector<2x128xf32>
    %139 = arith.mulf %136, %138 : vector<2x128xf32>
    %140 = arith.addf %134, %139 : vector<2x128xf32>
    %c0_99 = arith.constant 0 : index
    %c3_100 = arith.constant 3 : index
    %c0_101 = arith.constant 0 : index
    %c0_102 = arith.constant 0 : index
    %141 = vector.load %arg4[%c0_99, %c3_100, %c0_101, %c0_102] : memref<1x4x2x128xf32, #tpu.memory_space<vmem>>, vector<1x1x2x128xf32>
    %142 = vector.shape_cast %141 : vector<1x1x2x128xf32> to vector<2x128xf32>
    %c19 = arith.constant 19 : index
    %143 = memref.load %arg2[%c19] : memref<32xf32, #tpu.memory_space<smem>>
    %144 = vector.broadcast %143 : f32 to vector<2x128xf32>
    %145 = arith.mulf %142, %144 : vector<2x128xf32>
    %146 = arith.addf %140, %145 : vector<2x128xf32>
    %c4_103 = arith.constant 4 : index
    %147 = memref.load %arg3[%c4_103] : memref<8xf32, #tpu.memory_space<smem>>
    %148 = vector.broadcast %147 : f32 to vector<2x128xf32>
    %149 = arith.addf %146, %148 : vector<2x128xf32>
    %cst_104 = arith.constant 0.000000e+00 : f32
    %150 = vector.broadcast %cst_104 : f32 to vector<2x128xf32>
    %151 = arith.maximumf %149, %150 : vector<2x128xf32>
    %c0_105 = arith.constant 0 : index
    %c4_106 = arith.constant 4 : index
    %c0_107 = arith.constant 0 : index
    %c0_108 = arith.constant 0 : index
    %152 = vector.load %arg5[%c0_105, %c4_106, %c0_107, %c0_108] : memref<1x8x2x128xf32, #tpu.memory_space<vmem>>, vector<1x1x2x128xf32>
    %153 = vector.shape_cast %152 : vector<1x1x2x128xf32> to vector<2x128xf32>
    %154 = vector.shape_cast %151 : vector<2x128xf32> to vector<1x1x2x128xf32>
    tpu.vector_store %arg5[%c0_105, %c4_106, %c0_107, %c0_108], %154 {strides = array<i32>} : memref<1x8x2x128xf32, #tpu.memory_space<vmem>>, vector<1x1x2x128xf32>,
    %c0_109 = arith.constant 0 : index
    %c0_110 = arith.constant 0 : index
    %c0_111 = arith.constant 0 : index
    %c0_112 = arith.constant 0 : index
    %155 = vector.load %arg4[%c0_109, %c0_110, %c0_111, %c0_112] : memref<1x4x2x128xf32, #tpu.memory_space<vmem>>, vector<1x1x2x128xf32>
    %156 = vector.shape_cast %155 : vector<1x1x2x128xf32> to vector<2x128xf32>
    %c20 = arith.constant 20 : index
    %157 = memref.load %arg2[%c20] : memref<32xf32, #tpu.memory_space<smem>>
    %158 = vector.broadcast %157 : f32 to vector<2x128xf32>
    %159 = arith.mulf %156, %158 : vector<2x128xf32>
    %c0_113 = arith.constant 0 : index
    %c1_114 = arith.constant 1 : index
    %c0_115 = arith.constant 0 : index
    %c0_116 = arith.constant 0 : index
    %160 = vector.load %arg4[%c0_113, %c1_114, %c0_115, %c0_116] : memref<1x4x2x128xf32, #tpu.memory_space<vmem>>, vector<1x1x2x128xf32>
    %161 = vector.shape_cast %160 : vector<1x1x2x128xf32> to vector<2x128xf32>
    %c21 = arith.constant 21 : index
    %162 = memref.load %arg2[%c21] : memref<32xf32, #tpu.memory_space<smem>>
    %163 = vector.broadcast %162 : f32 to vector<2x128xf32>
    %164 = arith.mulf %161, %163 : vector<2x128xf32>
    %165 = arith.addf %159, %164 : vector<2x128xf32>
    %c0_117 = arith.constant 0 : index
    %c2_118 = arith.constant 2 : index
    %c0_119 = arith.constant 0 : index
    %c0_120 = arith.constant 0 : index
    %166 = vector.load %arg4[%c0_117, %c2_118, %c0_119, %c0_120] : memref<1x4x2x128xf32, #tpu.memory_space<vmem>>, vector<1x1x2x128xf32>
    %167 = vector.shape_cast %166 : vector<1x1x2x128xf32> to vector<2x128xf32>
    %c22 = arith.constant 22 : index
    %168 = memref.load %arg2[%c22] : memref<32xf32, #tpu.memory_space<smem>>
    %169 = vector.broadcast %168 : f32 to vector<2x128xf32>
    %170 = arith.mulf %167, %169 : vector<2x128xf32>
    %171 = arith.addf %165, %170 : vector<2x128xf32>
    %c0_121 = arith.constant 0 : index
    %c3_122 = arith.constant 3 : index
    %c0_123 = arith.constant 0 : index
    %c0_124 = arith.constant 0 : index
    %172 = vector.load %arg4[%c0_121, %c3_122, %c0_123, %c0_124] : memref<1x4x2x128xf32, #tpu.memory_space<vmem>>, vector<1x1x2x128xf32>
    %173 = vector.shape_cast %172 : vector<1x1x2x128xf32> to vector<2x128xf32>
    %c23 = arith.constant 23 : index
    %174 = memref.load %arg2[%c23] : memref<32xf32, #tpu.memory_space<smem>>
    %175 = vector.broadcast %174 : f32 to vector<2x128xf32>
    %176 = arith.mulf %173, %175 : vector<2x128xf32>
    %177 = arith.addf %171, %176 : vector<2x128xf32>
    %c5_125 = arith.constant 5 : index
    %178 = memref.load %arg3[%c5_125] : memref<8xf32, #tpu.memory_space<smem>>
    %179 = vector.broadcast %178 : f32 to vector<2x128xf32>
    %180 = arith.addf %177, %179 : vector<2x128xf32>
    %cst_126 = arith.constant 0.000000e+00 : f32
    %181 = vector.broadcast %cst_126 : f32 to vector<2x128xf32>
    %182 = arith.maximumf %180, %181 : vector<2x128xf32>
    %c0_127 = arith.constant 0 : index
    %c5_128 = arith.constant 5 : index
    %c0_129 = arith.constant 0 : index
    %c0_130 = arith.constant 0 : index
    %183 = vector.load %arg5[%c0_127, %c5_128, %c0_129, %c0_130] : memref<1x8x2x128xf32, #tpu.memory_space<vmem>>, vector<1x1x2x128xf32>
    %184 = vector.shape_cast %183 : vector<1x1x2x128xf32> to vector<2x128xf32>
    %185 = vector.shape_cast %182 : vector<2x128xf32> to vector<1x1x2x128xf32>
    tpu.vector_store %arg5[%c0_127, %c5_128, %c0_129, %c0_130], %185 {strides = array<i32>} : memref<1x8x2x128xf32, #tpu.memory_space<vmem>>, vector<1x1x2x128xf32>,
    %c0_131 = arith.constant 0 : index
    %c0_132 = arith.constant 0 : index
    %c0_133 = arith.constant 0 : index
    %c0_134 = arith.constant 0 : index
    %186 = vector.load %arg4[%c0_131, %c0_132, %c0_133, %c0_134] : memref<1x4x2x128xf32, #tpu.memory_space<vmem>>, vector<1x1x2x128xf32>
    %187 = vector.shape_cast %186 : vector<1x1x2x128xf32> to vector<2x128xf32>
    %c24 = arith.constant 24 : index
    %188 = memref.load %arg2[%c24] : memref<32xf32, #tpu.memory_space<smem>>
    %189 = vector.broadcast %188 : f32 to vector<2x128xf32>
    %190 = arith.mulf %187, %189 : vector<2x128xf32>
    %c0_135 = arith.constant 0 : index
    %c1_136 = arith.constant 1 : index
    %c0_137 = arith.constant 0 : index
    %c0_138 = arith.constant 0 : index
    %191 = vector.load %arg4[%c0_135, %c1_136, %c0_137, %c0_138] : memref<1x4x2x128xf32, #tpu.memory_space<vmem>>, vector<1x1x2x128xf32>
    %192 = vector.shape_cast %191 : vector<1x1x2x128xf32> to vector<2x128xf32>
    %c25 = arith.constant 25 : index
    %193 = memref.load %arg2[%c25] : memref<32xf32, #tpu.memory_space<smem>>
    %194 = vector.broadcast %193 : f32 to vector<2x128xf32>
    %195 = arith.mulf %192, %194 : vector<2x128xf32>
    %196 = arith.addf %190, %195 : vector<2x128xf32>
    %c0_139 = arith.constant 0 : index
    %c2_140 = arith.constant 2 : index
    %c0_141 = arith.constant 0 : index
    %c0_142 = arith.constant 0 : index
    %197 = vector.load %arg4[%c0_139, %c2_140, %c0_141, %c0_142] : memref<1x4x2x128xf32, #tpu.memory_space<vmem>>, vector<1x1x2x128xf32>
    %198 = vector.shape_cast %197 : vector<1x1x2x128xf32> to vector<2x128xf32>
    %c26 = arith.constant 26 : index
    %199 = memref.load %arg2[%c26] : memref<32xf32, #tpu.memory_space<smem>>
    %200 = vector.broadcast %199 : f32 to vector<2x128xf32>
    %201 = arith.mulf %198, %200 : vector<2x128xf32>
    %202 = arith.addf %196, %201 : vector<2x128xf32>
    %c0_143 = arith.constant 0 : index
    %c3_144 = arith.constant 3 : index
    %c0_145 = arith.constant 0 : index
    %c0_146 = arith.constant 0 : index
    %203 = vector.load %arg4[%c0_143, %c3_144, %c0_145, %c0_146] : memref<1x4x2x128xf32, #tpu.memory_space<vmem>>, vector<1x1x2x128xf32>
    %204 = vector.shape_cast %203 : vector<1x1x2x128xf32> to vector<2x128xf32>
    %c27 = arith.constant 27 : index
    %205 = memref.load %arg2[%c27] : memref<32xf32, #tpu.memory_space<smem>>
    %206 = vector.broadcast %205 : f32 to vector<2x128xf32>
    %207 = arith.mulf %204, %206 : vector<2x128xf32>
    %208 = arith.addf %202, %207 : vector<2x128xf32>
    %c6_147 = arith.constant 6 : index
    %209 = memref.load %arg3[%c6_147] : memref<8xf32, #tpu.memory_space<smem>>
    %210 = vector.broadcast %209 : f32 to vector<2x128xf32>
    %211 = arith.addf %208, %210 : vector<2x128xf32>
    %cst_148 = arith.constant 0.000000e+00 : f32
    %212 = vector.broadcast %cst_148 : f32 to vector<2x128xf32>
    %213 = arith.maximumf %211, %212 : vector<2x128xf32>
    %c0_149 = arith.constant 0 : index
    %c6_150 = arith.constant 6 : index
    %c0_151 = arith.constant 0 : index
    %c0_152 = arith.constant 0 : index
    %214 = vector.load %arg5[%c0_149, %c6_150, %c0_151, %c0_152] : memref<1x8x2x128xf32, #tpu.memory_space<vmem>>, vector<1x1x2x128xf32>
    %215 = vector.shape_cast %214 : vector<1x1x2x128xf32> to vector<2x128xf32>
    %216 = vector.shape_cast %213 : vector<2x128xf32> to vector<1x1x2x128xf32>
    tpu.vector_store %arg5[%c0_149, %c6_150, %c0_151, %c0_152], %216 {strides = array<i32>} : memref<1x8x2x128xf32, #tpu.memory_space<vmem>>, vector<1x1x2x128xf32>,
    %c0_153 = arith.constant 0 : index
    %c0_154 = arith.constant 0 : index
    %c0_155 = arith.constant 0 : index
    %c0_156 = arith.constant 0 : index
    %217 = vector.load %arg4[%c0_153, %c0_154, %c0_155, %c0_156] : memref<1x4x2x128xf32, #tpu.memory_space<vmem>>, vector<1x1x2x128xf32>
    %218 = vector.shape_cast %217 : vector<1x1x2x128xf32> to vector<2x128xf32>
    %c28 = arith.constant 28 : index
    %219 = memref.load %arg2[%c28] : memref<32xf32, #tpu.memory_space<smem>>
    %220 = vector.broadcast %219 : f32 to vector<2x128xf32>
    %221 = arith.mulf %218, %220 : vector<2x128xf32>
    %c0_157 = arith.constant 0 : index
    %c1_158 = arith.constant 1 : index
    %c0_159 = arith.constant 0 : index
    %c0_160 = arith.constant 0 : index
    %222 = vector.load %arg4[%c0_157, %c1_158, %c0_159, %c0_160] : memref<1x4x2x128xf32, #tpu.memory_space<vmem>>, vector<1x1x2x128xf32>
    %223 = vector.shape_cast %222 : vector<1x1x2x128xf32> to vector<2x128xf32>
    %c29 = arith.constant 29 : index
    %224 = memref.load %arg2[%c29] : memref<32xf32, #tpu.memory_space<smem>>
    %225 = vector.broadcast %224 : f32 to vector<2x128xf32>
    %226 = arith.mulf %223, %225 : vector<2x128xf32>
    %227 = arith.addf %221, %226 : vector<2x128xf32>
    %c0_161 = arith.constant 0 : index
    %c2_162 = arith.constant 2 : index
    %c0_163 = arith.constant 0 : index
    %c0_164 = arith.constant 0 : index
    %228 = vector.load %arg4[%c0_161, %c2_162, %c0_163, %c0_164] : memref<1x4x2x128xf32, #tpu.memory_space<vmem>>, vector<1x1x2x128xf32>
    %229 = vector.shape_cast %228 : vector<1x1x2x128xf32> to vector<2x128xf32>
    %c30 = arith.constant 30 : index
    %230 = memref.load %arg2[%c30] : memref<32xf32, #tpu.memory_space<smem>>
    %231 = vector.broadcast %230 : f32 to vector<2x128xf32>
    %232 = arith.mulf %229, %231 : vector<2x128xf32>
    %233 = arith.addf %227, %232 : vector<2x128xf32>
    %c0_165 = arith.constant 0 : index
    %c3_166 = arith.constant 3 : index
    %c0_167 = arith.constant 0 : index
    %c0_168 = arith.constant 0 : index
    %234 = vector.load %arg4[%c0_165, %c3_166, %c0_167, %c0_168] : memref<1x4x2x128xf32, #tpu.memory_space<vmem>>, vector<1x1x2x128xf32>
    %235 = vector.shape_cast %234 : vector<1x1x2x128xf32> to vector<2x128xf32>
    %c31 = arith.constant 31 : index
    %236 = memref.load %arg2[%c31] : memref<32xf32, #tpu.memory_space<smem>>
    %237 = vector.broadcast %236 : f32 to vector<2x128xf32>
    %238 = arith.mulf %235, %237 : vector<2x128xf32>
    %239 = arith.addf %233, %238 : vector<2x128xf32>
    %c7_169 = arith.constant 7 : index
    %240 = memref.load %arg3[%c7_169] : memref<8xf32, #tpu.memory_space<smem>>
    %241 = vector.broadcast %240 : f32 to vector<2x128xf32>
    %242 = arith.addf %239, %241 : vector<2x128xf32>
    %cst_170 = arith.constant 0.000000e+00 : f32
    %243 = vector.broadcast %cst_170 : f32 to vector<2x128xf32>
    %244 = arith.maximumf %242, %243 : vector<2x128xf32>
    %c0_171 = arith.constant 0 : index
    %c7_172 = arith.constant 7 : index
    %c0_173 = arith.constant 0 : index
    %c0_174 = arith.constant 0 : index
    %245 = vector.load %arg5[%c0_171, %c7_172, %c0_173, %c0_174] : memref<1x8x2x128xf32, #tpu.memory_space<vmem>>, vector<1x1x2x128xf32>
    %246 = vector.shape_cast %245 : vector<1x1x2x128xf32> to vector<2x128xf32>
    %247 = vector.shape_cast %244 : vector<2x128xf32> to vector<1x1x2x128xf32>
    tpu.vector_store %arg5[%c0_171, %c7_172, %c0_173, %c0_174], %247 {strides = array<i32>} : memref<1x8x2x128xf32, #tpu.memory_space<vmem>>, vector<1x1x2x128xf32>,
    return
  }
  func.func @transform_0(%arg0: i32, %arg1: i32) -> i32 {
    %c0_i32 = arith.constant 0 : i32
    %c0_i32_0 = arith.constant 0 : i32
    return %c0_i32 : i32
  }
  func.func @transform_1(%arg0: i32, %arg1: i32) -> i32 {
    %c0_i32 = arith.constant 0 : i32
    %c0_i32_0 = arith.constant 0 : i32
    return %c0_i32 : i32
  }
  func.func @transform_2(%arg0: i32, %arg1: i32) -> (i32, i32, i32, i32) {
    %c0_i32 = arith.constant 0 : i32
    %c0_i32_0 = arith.constant 0 : i32
    %c0_i32_1 = arith.constant 0 : i32
    return %arg0, %c0_i32, %arg1, %c0_i32_0 : i32, i32, i32, i32
  }
  func.func @transform_3(%arg0: i32, %arg1: i32) -> (i32, i32, i32, i32) {
    %c0_i32 = arith.constant 0 : i32
    %c0_i32_0 = arith.constant 0 : i32
    %c0_i32_1 = arith.constant 0 : i32
    return %arg0, %c0_i32, %arg1, %c0_i32_0 : i32, i32, i32, i32
  }
}

</mosaic_0001>

<bundles_post_ra>
// kernel: tpu_custom_call.1
= control target key start
LH: loop header
LB: loop body
LE: loop exit
PB: predicated region body
PF: predicated region fallthrough
CT: control target
= control target key end

     0   :  { %s1186_s0 = inlined_call_operand.hbm [shape: f32[32], index: 0, kind: input, shape index: {}]   ;;  %s1187_s1 = inlined_call_operand.hbm [shape: f32[8], index: 1, kind: input, shape index: {}]   ;;  %s1188_s2 = inlined_call_operand.hbm [shape: f32[2,4,2,128], index: 2, kind: input, shape index: {}]   ;;  %s1189_s3 = inlined_call_operand.hbm [shape: f32[2,8,2,128], index: 3, kind: output, shape index: {}]  }
   0x1   :  { %1190 = sst [smem:[#allocation14_spill]] %s1186_s0 }
   0x2   :  { %8 = vsyncpa [#allocation5], 0 }
   0x3   :  { %9 = vsyncpa [#allocation7], 0 }
   0x4   :  { %10 = vsyncpa [#allocation3], 0 }
   0x5   :  { %12 = vsyncpa [#allocation3 + $0x1], 0 }
   0x6   :  { %13 = vsyncpa [#allocation4], 0 }
   0x7   :  { %15 = vsyncpa [#allocation4 + $0x1], 0  ;;  %s916_s12 = smov 0   ;;  %s918_s13 = smov 0  }
   0x8   :  { %s920_s14 = smov 0   ;;  %s922_s15 = smov 0  }
   0x9   :  { %s924_s16 = smov 0   ;;  %s926_s17 = smov 0  }
   0xa LB: > { %s561_s18 = sadd.s32 4294967295, %s888_s17   ;;  %s562_s19 = sadd.s32 4294967294, %s888_s17   ;;  %s888_s17 = sphi %s926_s17, %s21_s17   ;;  %s884_s16 = sphi %s924_s16, %s1203_s16   ;;  %s880_s15 = sphi %s922_s15, %s1202_s15   ;;  %s876_s14 = sphi %s920_s14, %s1201_s14   ;;  %s872_s13 = sphi %s918_s13, %s1200_s13   ;;  %s868_s12 = sphi %s916_s12, %s1199_s12  }
   0xb   : > { %s84_s20 = sadd.s32 1, %s876_s14  ;;  %p91_p0 = scmp.ne.s32.totalorder %s876_s14, %s872_s13 }
   0xc   : > { %p92_p1 = scmp.eq.s32.totalorder %s888_s17, 0  ;;  %p97_p2 = scmp.ne.s32.totalorder %s872_s13, %s868_s12 }
   0xd   : > { %p954_p3 = scmp.eq.s32.totalorder %s561_s18, 0  ;;  %p123_p4 = scmp.eq.s32.totalorder %s561_s18, 1 }
   0xe   : > { %p958_p5 = por %p92_p1, %p91_p0  ;;  %p129_p6 = scmp.eq.s32.totalorder %s562_s19, 1 }
   0xf   : > { %p964_p7 = por %p954_p3, %p97_p2  ;;  %p968_p8 = por %p123_p4, %p91_p0 }
  0x10   : > { %p972_p9 = por %p129_p6, %p97_p2  ;;  %p563_p10 = scmp.ge.s32.totalorder %s888_s17, 1 }
  0x11   : > { %p136_p11 = scmp.lt.s32.totalorder %s888_s17, 3  ;;  %s1196_s0 = sld [smem:[#allocation14_spill]] }
  0x12   : > { %p566_p13 = scmp.ge.s32.totalorder %s888_s17, 2  ;;  %p680_p0 = scmp.lt.s32.totalorder %s888_s17, 2 }
  0x13   : > { %p981_p12 = pnand %p563_p10, %p136_p11  ;;  %s158_s5 = sshll.u32 %s1187_s1, 4  ;;  %s159_s5 = int_to_ptr.hbm [resolvable:$true] %s158_s5 }
  0x14   : > { %p994_p2 = pnand %p680_p0, %p958_p5  ;;  %s890_s7 = smov [#allocation2]  }
  0x15   : > { %p663_p1 = pneg %p981_p12  ;;  %s891_s8 = smov [#allocation6]  }
  0x16   : > { %s33_s9 = sadd.s32 1, %s884_s16  ;;  %s169_s10 = sand.u32 1, %s876_s14  }
  0x17   : > { %s148_s28 = sshll.u32 %s1196_s0, 4  ;;  %p664_p4 = pnand %p663_p1, %p954_p3  ;;  %s149_s28 = int_to_ptr.hbm [resolvable:$true] %s148_s28 }
  0x18   : > { %p35_p6 = scmp.ge.s32.totalorder %s33_s9, 2  ;;  %s567_s11 = sshll.u32 %s169_s10, 3 }
  0x19   : > { %666 = dma.hbm_to_smem (!%p664_p4), %s149_s28, 16, %s890_s7, [#allocation5]  }
  0x1a   : > { %669 = dma.hbm_to_smem (!%p664_p4), %s159_s5, 16, %s891_s8, [#allocation7]  }
  0x1b   : > { %s649_s18 = sshll.u32 %s884_s16, 3  ;;  %s1205_s9 = smov (%p35_p6, %s33_s9), 0 }
  0x1c   : > { %s179_s26 = scalar_lea.hbm %s1188_s2, %s649_s18  ;;  %s79_s27 = ssub.s32 %s884_s16, %s1205_s9 }
  0x1d   : > { %s180_s30 = sshll.u32 %s179_s26, 4  ;;  %p82_p5 = scmp.eq.s32.totalorder %s79_s27, 0  ;;  %s181_s30 = int_to_ptr.hbm [resolvable:$true] %s180_s30 }
  0x1e   : > { %s173_s28 = scalar_lea.vmem [#allocation8], %s567_s11  ;;  %s170_s7 = scalar_lea.sflag [#allocation3], %s169_s10 }
  0x1f   : > { %s182_s4 = sshll.u32 %s173_s28, 4  ;;  %s892_s8 = smov 32   ;;  %s183_s4 = int_to_ptr.vmem [resolvable:$true] %s182_s4 }
  0x20   : > { %s1013_s5 = scalar_select %p82_p5, %s876_s14, %s84_s20  }
  0x21   : > { %s893_s0 = smov 2   ;;  %194 = sbr.rel (%p981_p12) target bundleno = 106 (0x6a), region = 32 }
  0x22   : > { %673 = dma.hbm_to_vmem [thread:$0]  (!%p994_p2), %s181_s30, 128, %s183_s4, %s170_s7, %s892_s8, %s892_s8, %s893_s0  }
  0x26   : > { %851 = dma.done.wait (%p954_p3), [#allocation5], 16  }
  0x27   : > { %853 = vsyncadd (%p954_p3), [#allocation5], 4294967280 }
  0x28   : > { %855 = dma.done.wait (%p954_p3), [#allocation7], 16  }
  0x29   : > { %857 = vsyncadd (%p954_p3), [#allocation7], 4294967280  ;;  %s1028_s20 = sand.u32 1, %s872_s13  }
  0x2a   : > { %s573_s0 = sshll.u32 %s1028_s20, 3  ;;  %s207_s29 = scalar_lea.sflag [#allocation3], %s1028_s20 }
  0x2b   : > { %s1032_s6 = scalar_lea.vmem [#allocation8], %s573_s0 }
  0x2c   : > { %859 = dma.done.wait (%p964_p7), %s207_s29, 128  }
  0x2d   : > { %861 = vsyncadd (%p964_p7), %s207_s29, 4294967168 }
  0x2e   : > { %216 = sfence }
  0x2f   : > { %s236_s10 = sld [smem:[#allocation2]]  ;;  %v235_v0 = vld [vmem:[%s1032_s6] sm:$0x3]  ;;  %v575_v1 = vld [vmem:[%s1032_s6 + $0x2] sm:$0x3]  ;;  %s574_s0 = sshll.u32 %s1028_s20, 4 }
  0x30   : > { %s576_s21 = sld [smem:[#allocation2 + $0x1]]  ;;  %v577_v3 = vld [vmem:[%s1032_s6 + $0x4] sm:$0x3]  ;;  %v579_v6 = vld [vmem:[%s1032_s6 + $0x6] sm:$0x3] }
  0x31   : > { %s578_s11 = sld [smem:[#allocation2 + $0x2]]  ;;  %v262_v11 = vld [vmem:[%s1032_s6] sm:$0x3]  ;;  %v582_v14 = vld [vmem:[%s1032_s6 + $0x2] sm:$0x3] }
  0x32   : > { %s580_s18 = sld [smem:[#allocation2 + $0x3]]  ;;  %v584_v16 = vld [vmem:[%s1032_s6 + $0x4] sm:$0x3]  ;;  %v586_v20 = vld [vmem:[%s1032_s6 + $0x6] sm:$0x3] }
  0x33   : > { %s1039_s19 = sld [smem:[#allocation6]]  ;;  %v287_v27 = vld [vmem:[%s1032_s6] sm:$0x3]  ;;  %v591_v30 = vld [vmem:[%s1032_s6 + $0x2] sm:$0x3] }
  0x34   : > { %s581_s22 = sld [smem:[#allocation2 + $0x4]]  ;;  %v593_v33 = vld [vmem:[%s1032_s6 + $0x4] sm:$0x3]  ;;  %v595_v37 = vld [vmem:[%s1032_s6 + $0x6] sm:$0x3] }
  0x35   : > { %v237_v2 = vstv %s236_s10  ;;  %s583_s23 = sld [smem:[#allocation2 + $0x5]]  ;;  %v312_v45 = vld [vmem:[%s1032_s6] sm:$0x3]  ;;  %v600_v48 = vld [vmem:[%s1032_s6 + $0x2] sm:$0x3] }
  0x36   : > { %v238_v4 = vmul.f32 %v237_v2, %v235_v0  ;;  %v242_v5 = vstv %s576_s21  ;;  %s585_s26 = sld [smem:[#allocation2 + $0x6]]  ;;  %v602_v51 = vld [vmem:[%s1032_s6 + $0x4] sm:$0x3]  ;;  %v604_v55 = vld [vmem:[%s1032_s6 + $0x6] sm:$0x3] }
  0x37   : > { %v243_v7 = vmul.f32 %v575_v1, %v242_v5  ;;  %v248_v8 = vstv %s578_s11  ;;  %s587_s27 = sld [smem:[#allocation2 + $0x7]]  ;;  %v337_v63 = vld [vmem:[%s1032_s6] sm:$0x3]  ;;  %v609_v2 = vld [vmem:[%s1032_s6 + $0x2] sm:$0x3] }
  0x38   : > { %v249_v9 = vmul.f32 %v577_v3, %v248_v8  ;;  %v254_v10 = vstv %s580_s18  ;;  %s1045_s30 = sld [smem:[#allocation6 + $0x1]]  ;;  %v611_v5 = vld [vmem:[%s1032_s6 + $0x4] sm:$0x3] }
  0x39   : > { %v244_v12 = vadd.f32 %v243_v7, %v238_v4  ;;  %v255_v13 = vmul.f32 %v579_v6, %v254_v10  ;;  %s590_s28 = sld [smem:[#allocation2 + $0x8]]  ;;  %v258_v21 = vstv %s1039_s19 }
  0x3a   : > { %v264_v15 = vstv %s581_s22  ;;  %s1049_s4 = sld [smem:[#allocation2 + $0x9]]  ;;  %s1076_s22 = scalar_lea.vmem [#allocation9], %s574_s0 }
  0x3b   : > { %v250_v17 = vadd.f32 %v249_v9, %v244_v12  ;;  %v265_v18 = vmul.f32 %v264_v15, %v262_v11  ;;  %v268_v19 = vstv %s583_s23  ;;  %s594_s7 = sld [smem:[#allocation2 + $0xa]]  ;;  %v613_v9 = vld [vmem:[%s1032_s6 + $0x6] sm:$0x3] }
  0x3c   : > { %v269_v22 = vmul.f32 %v582_v14, %v268_v19  ;;  %v273_v23 = vstv %s585_s26  ;;  %s1053_s8 = sld [smem:[#allocation2 + $0xb]] }
  0x3d   : > { %v256_v24 = vadd.f32 %v255_v13, %v250_v17  ;;  %v274_v25 = vmul.f32 %v584_v16, %v273_v23  ;;  %v278_v26 = vstv %s587_s27  ;;  %s1057_s29 = sld [smem:[#allocation6 + $0x2]]  ;;  %v362_v17 = vld [vmem:[%s1032_s6] sm:$0x3]  ;;  %v620_v23 = vld [vmem:[%s1032_s6 + $0x4] sm:$0x3] }
  0x3e   : > { %v270_v28 = vadd.f32 %v269_v22, %v265_v18  ;;  %v279_v29 = vmul.f32 %v586_v20, %v278_v26  ;;  %s1060_s10 = sld [smem:[#allocation2 + $0xc]]  ;;  %v282_v39 = vstv %s1045_s30  ;;  %v618_v20 = vld [vmem:[%s1032_s6 + $0x2] sm:$0x3] }
  0x3f   : > { %v259_v31 = vadd.f32 %v258_v21, %v256_v24  ;;  %v289_v32 = vstv %s590_s28  ;;  %s1063_s21 = sld [smem:[#allocation2 + $0xd]] }
  0x40   : > { %v275_v34 = vadd.f32 %v274_v25, %v270_v28  ;;  %v290_v35 = vmul.f32 %v289_v32, %v287_v27  ;;  %v293_v36 = vstv %s1049_s4  ;;  %s1067_s11 = sld [smem:[#allocation2 + $0xe]]  ;;  %v622_v27 = vld [vmem:[%s1032_s6 + $0x6] sm:$0x3] }
  0x41   : > { %v260_v38 = vmax.f32 %v259_v31, 0.0  ;;  %v294_v40 = vmul.f32 %v591_v30, %v293_v36  ;;  %v298_v41 = vstv %s594_s7  ;;  %s1070_s18 = sld [smem:[#allocation2 + $0xf]] }
  0x42   : > { %v280_v42 = vadd.f32 %v279_v29, %v275_v34  ;;  %v299_v43 = vmul.f32 %v593_v33, %v298_v41  ;;  %v303_v44 = vstv %s1053_s8  ;;  %s1074_s19 = sld [smem:[#allocation6 + $0x3]]  ;;  %v629_v41 = vld [vmem:[%s1032_s6 + $0x4] sm:$0x3] }
  0x43   : > { %261 = vst [vmem:[%s1076_s22] sm:$0x3] %v260_v38  ;;  %v295_v46 = vadd.f32 %v294_v40, %v290_v35  ;;  %v304_v47 = vmul.f32 %v595_v37, %v303_v44  ;;  %s608_s23 = sld [smem:[#allocation2 + $0x10]]  ;;  %v307_v57 = vstv %s1057_s29  ;;  %v387_v35 = vld [vmem:[%s1032_s6] sm:$0x3]  ;;  %v627_v38 = vld [vmem:[%s1032_s6 + $0x2] sm:$0x3] }
  0x44   : > { %v283_v49 = vadd.f32 %v282_v39, %v280_v42  ;;  %v314_v50 = vstv %s1060_s10  ;;  %s1082_s26 = sld [smem:[#allocation2 + $0x11]] }
  0x45   : > { %v300_v52 = vadd.f32 %v299_v43, %v295_v46  ;;  %v315_v53 = vmul.f32 %v314_v50, %v312_v45  ;;  %v318_v54 = vstv %s1063_s21  ;;  %s1086_s27 = sld [smem:[#allocation2 + $0x12]]  ;;  %v631_v45 = vld [vmem:[%s1032_s6 + $0x6] sm:$0x3] }
  0x46   : > { %v284_v56 = vmax.f32 %v283_v49, 0.0  ;;  %v319_v58 = vmul.f32 %v600_v48, %v318_v54  ;;  %v323_v59 = vstv %s1067_s11  ;;  %s1090_s30 = sld [smem:[#allocation2 + $0x13]] }
  0x47   : > { %v305_v60 = vadd.f32 %v304_v47, %v300_v52  ;;  %v324_v61 = vmul.f32 %v602_v51, %v323_v59  ;;  %v328_v62 = vstv %s1070_s18  ;;  %s1094_s28 = sld [smem:[#allocation6 + $0x4]]  ;;  %v638_v59 = vld [vmem:[%s1032_s6 + $0x4] sm:$0x3] }
  0x48   : > { %589 = vst [vmem:[%s1076_s22 + $0x2] sm:$0x3] %v284_v56  ;;  %v320_v0 = vadd.f32 %v319_v58, %v315_v53  ;;  %v329_v1 = vmul.f32 %v604_v55, %v328_v62  ;;  %s617_s4 = sld [smem:[#allocation2 + $0x14]]  ;;  %v332_v11 = vstv %s1074_s19  ;;  %v412_v53 = vld [vmem:[%s1032_s6] sm:$0x3] }
  0x49   : > { %v308_v3 = vadd.f32 %v307_v57, %v305_v60  ;;  %v339_v4 = vstv %s608_s23  ;;  %s1099_s7 = sld [smem:[#allocation2 + $0x15]]  ;;  %v636_v56 = vld [vmem:[%s1032_s6 + $0x2] sm:$0x3] }
  0x4a   : > { %v325_v6 = vadd.f32 %v324_v61, %v320_v0  ;;  %v340_v7 = vmul.f32 %v339_v4, %v337_v63  ;;  %v343_v8 = vstv %s1082_s26  ;;  %s1103_s8 = sld [smem:[#allocation2 + $0x16]]  ;;  %v640_v63 = vld [vmem:[%s1032_s6 + $0x6] sm:$0x3]  ;;  %s451_s6 = sshll.u32 %s1076_s22, 4  ;;  %s452_s6 = int_to_ptr.vmem [resolvable:$true] %s451_s6 }
  0x4b   : > { %v309_v10 = vmax.f32 %v308_v3, 0.0  ;;  %v344_v12 = vmul.f32 %v609_v2, %v343_v8  ;;  %v348_v13 = vstv %s1086_s27  ;;  %s1107_s0 = sld [smem:[#allocation2 + $0x17]] }
  0x4c   : > { %v330_v14 = vadd.f32 %v329_v1, %v325_v6  ;;  %v349_v15 = vmul.f32 %v611_v5, %v348_v13  ;;  %v353_v16 = vstv %s1090_s30  ;;  %s1111_s29 = sld [smem:[#allocation6 + $0x5]] }
  0x4d   : > { %598 = vst [vmem:[%s1076_s22 + $0x4] sm:$0x3] %v309_v10  ;;  %v345_v18 = vadd.f32 %v344_v12, %v340_v7  ;;  %v354_v19 = vmul.f32 %v613_v9, %v353_v16  ;;  %s626_s10 = sld [smem:[#allocation2 + $0x18]]  ;;  %v357_v29 = vstv %s1094_s28 }
  0x4e   : > { %v333_v21 = vadd.f32 %v332_v11, %v330_v14  ;;  %v364_v22 = vstv %s617_s4  ;;  %s1116_s21 = sld [smem:[#allocation2 + $0x19]]  ;;  %s650_s4 = sshll.u32 %s880_s15, 4 }
  0x4f   : > { %v350_v24 = vadd.f32 %v349_v15, %v345_v18  ;;  %v365_v25 = vmul.f32 %v364_v22, %v362_v17  ;;  %v368_v26 = vstv %s1099_s7  ;;  %s1120_s11 = sld [smem:[#allocation2 + $0x1a]] }
  0x50   : > { %v334_v28 = vmax.f32 %v333_v21, 0.0  ;;  %v369_v30 = vmul.f32 %v618_v20, %v368_v26  ;;  %v373_v31 = vstv %s1103_s8  ;;  %s1124_s18 = sld [smem:[#allocation2 + $0x1b]] }
  0x51   : > { %v355_v32 = vadd.f32 %v354_v19, %v350_v24  ;;  %v374_v33 = vmul.f32 %v620_v23, %v373_v31  ;;  %v378_v34 = vstv %s1107_s0  ;;  %s1128_s19 = sld [smem:[#allocation6 + $0x6]]  ;;  %s450_s0 = scalar_lea.hbm %s1189_s3, %s650_s4 }
  0x52   : > { %607 = vst [vmem:[%s1076_s22 + $0x6] sm:$0x3] %v334_v28  ;;  %v370_v36 = vadd.f32 %v369_v30, %v365_v25  ;;  %v379_v37 = vmul.f32 %v622_v27, %v378_v34  ;;  %s635_s23 = sld [smem:[#allocation2 + $0x1c]]  ;;  %v382_v47 = vstv %s1111_s29  ;;  %s453_s15 = sshll.u32 %s450_s0, 4  ;;  %s454_s15 = int_to_ptr.hbm [resolvable:$true] %s453_s15 }
  0x53   : > { %v358_v39 = vadd.f32 %v357_v29, %v355_v32  ;;  %v389_v40 = vstv %s626_s10  ;;  %s637_s26 = sld [smem:[#allocation2 + $0x1d]]  ;;  %s438_s29 = scalar_lea.sflag [#allocation4], %s1028_s20 }
  0x54   : > { %v375_v42 = vadd.f32 %v374_v33, %v370_v36  ;;  %v390_v43 = vmul.f32 %v389_v40, %v387_v35  ;;  %v393_v44 = vstv %s1116_s21  ;;  %s639_s27 = sld [smem:[#allocation2 + $0x1e]]  ;;  %s812_s10 = sshra.s32 %s454_s15, 4  ;;  %s813_s10 = int_to_ptr.hbm [resolvable:$true] %s812_s10 }
  0x55   : > { %v359_v46 = vmax.f32 %v358_v39, 0.0  ;;  %v394_v48 = vmul.f32 %v627_v38, %v393_v44  ;;  %v398_v49 = vstv %s1120_s11  ;;  %s641_s30 = sld [smem:[#allocation2 + $0x1f]]  ;;  %s814_s21 = scalar_lea.hbm %s813_s10, 16 }
  0x56   : > { %v380_v50 = vadd.f32 %v379_v37, %v375_v42  ;;  %v399_v51 = vmul.f32 %v629_v41, %v398_v49  ;;  %v403_v52 = vstv %s1124_s18  ;;  %s642_s28 = sld [smem:[#allocation6 + $0x7]]  ;;  %p815_p3 = scmp.ne.s32.totalorder %s813_s10, %s814_s21 }
  0x57   : > { %616 = vst [vmem:[%s1076_s22 + $0x8] sm:$0x3] %v359_v46  ;;  %v395_v54 = vadd.f32 %v394_v48, %v390_v43  ;;  %v404_v55 = vmul.f32 %v631_v45, %v403_v52  ;;  %v407_v1 = vstv %s1128_s19  ;;  %s818_s19 = scalar_lea.hbm %s1189_s3, 32  ;;  %p819_p11 = scmp.lt.s32.totalorder %s813_s10, %s1189_s3 }
  0x58   : > { %v383_v57 = vadd.f32 %v382_v47, %v380_v50  ;;  %v414_v58 = vstv %s635_s23  ;;  %p816_p7 = pnand %p815_p3, %p968_p8  ;;  %p820_p12 = scmp.lt.s32.totalorder %s818_s19, %s814_s21 }
  0x59   : > { %v400_v60 = vadd.f32 %v399_v51, %v395_v54  ;;  %v415_v61 = vmul.f32 %v414_v58, %v412_v53  ;;  %v418_v62 = vstv %s637_s26 }
  0x5a   : > { %v384_v0 = vmax.f32 %v383_v57, 0.0  ;;  %v419_v2 = vmul.f32 %v636_v56, %v418_v62  ;;  %v423_v3 = vstv %s639_s27  ;;  %p817_p10 = pneg %p816_p7  ;;  %p821_p0 = por %p820_p12, %p819_p11 }
  0x5b   : > { %v405_v4 = vadd.f32 %v404_v55, %v400_v60  ;;  %v424_v5 = vmul.f32 %v638_v59, %v423_v3  ;;  %v428_v6 = vstv %s641_s30 }
  0x5c   : > { %625 = vst [vmem:[%s1076_s22 + $0xa] sm:$0x3] %v384_v0  ;;  %v420_v7 = vadd.f32 %v419_v2, %v415_v61  ;;  %v429_v8 = vmul.f32 %v640_v63, %v428_v6  ;;  %v432_v12 = vstv %s642_s28  ;;  %p822_p1 = pnand %p821_p0, %p817_p10 }
  0x5d   : > { %v408_v9 = vadd.f32 %v407_v1, %v405_v4 }
  0x5e   : > { %v425_v10 = vadd.f32 %v424_v5, %v420_v7 }
  0x5f   : > { %v409_v11 = vmax.f32 %v408_v9, 0.0 }
  0x60   : > { %v430_v13 = vadd.f32 %v429_v8, %v425_v10 }
  0x61   : > { %634 = vst [vmem:[%s1076_s22 + $0xc] sm:$0x3] %v409_v11 }
  0x62   : > { %v433_v14 = vadd.f32 %v432_v12, %v430_v13 }
  0x64   : > { %v434_v15 = vmax.f32 %v433_v14, 0.0 }
  0x66   : > { %643 = vst [vmem:[%s1076_s22 + $0xe] sm:$0x3] %v434_v15 }
  0x67   : > { %825 = shalt.err (!%p822_p1)
}
  0x68   : > { %s894_s20 = smov 32   ;;  %s895_s22 = smov 2  }
  0x69   : > { %661 = dma.vmem_to_hbm [thread:$0]  (%p968_p8), %s452_s6, 256, %s454_s15, %s438_s29, %s894_s20, %s894_s20, %s895_s22  }
  0x6a PF: > { %s468_s27 = sand.u32 1, %s868_s12   ;;  %p675_p2 = pnand %p566_p13, %p972_p9 }
  0x6b   : > { %s469_s30 = scalar_lea.sflag [#allocation4], %s468_s27 }
  0x6c   : > { %p676_p4 = pneg %p675_p2 }
  0x6e   : > { %863 = dma.done.wait (%p676_p4), %s469_s30, 256  }
  0x6f   : > { %865 = vsyncadd (%p676_p4), %s469_s30, 4294967040  ;;  %s21_s17 = sadd.s32 1, %s888_s17   ;;  %s1199_s12 = smov %s872_s13 }
  0x70   : > { %p18_p6 = scmp.ge.s32.totalorder %s21_s17, 4   ;;  %s1200_s13 = smov %s876_s14 }
  0x71   : > { %s1201_s14 = smov %s1013_s5  ;;  %s1202_s15 = smov %s884_s16 }
  0x72   : > { %s1203_s16 = smov %s1205_s9  ;;  %20 = sbr.rel (!%p18_p6) target bundleno = 10 (0xa), region = 96 }
  0x77   :  { %475 = vsyncpa [#allocation3], 1 }
  0x78   :  { %477 = vsyncpa [#allocation3 + $0x1], 1 }
  0x79   :  { %478 = vsyncpa [#allocation4], 1 }
  0x7a   :  { %480 = vsyncpa [#allocation4 + $0x1], 1 }
  0x7b   :  { %481 = vsyncpa [#allocation5], 1 }
  0x7c   :  { %483 = vsyncpa [#allocation5 + $0x1], 1 }
  0x7d   :  { %484 = vsyncpa [#allocation7], 1 }

</bundles_post_ra>
